<compile_context>
chip_gen: v6e
topology: v6e:2x2x1
jax: 0.10.0
libtpu: 0.0.40
codegen_flags: <defaults>
</compile_context>

<pallas_src>
import functools
import math

import jax
import jax.numpy as jnp
from jax import lax
from jax.experimental import pallas as pl
from jax.experimental.pallas import tpu as pltpu

_LANE = 128


def _norm_kernel_rowwise(x_ref, alpha_ref, bias_ref, o_ref, *, eps, d_model, approx):
    # x_ref: (TR, d_model); alpha/bias: (1, d_model)
    x = x_ref[...].astype(jnp.float32)
    mean = jnp.mean(x, axis=-1, keepdims=True)                      # XLU cross-lane reduce
    xc = x - mean
    # torch.std uses Bessel's correction (ddof=1); d_model == 1 yields NaN, same as torch.
    var = jnp.sum(xc * xc, axis=-1, keepdims=True) * jnp.float32(1.0 / (d_model - 1))
    std = jnp.sqrt(var)
    # Per-row reciprocal + per-element multiply instead of a per-element VPU divide.
    inv = pl.reciprocal(std + jnp.float32(eps), approx=approx)
    alpha = alpha_ref[...].astype(jnp.float32)
    bias = bias_ref[...].astype(jnp.float32)
    o_ref[...] = (xc * inv * alpha + bias).astype(o_ref.dtype)


def _norm_kernel_folded(x_ref, seg_ref, alpha_ref, bias_ref, o_ref, *, eps, d_model, approx):
    # Lane-dense layout: each (1, 128) lane row holds k = 128 // d_model logical rows.
    # Segmented (per-logical-row) sums via a block-diagonal ones matrix on the MXU;
    # the matmul also broadcasts each segment's sum back to all of its lanes, so no
    # cross-lane reshapes are needed.
    x = x_ref[...].astype(jnp.float32)                              # (TR, 128)
    seg = seg_ref[...]                                              # (128, 128) block-diag ones
    seg_sum = jnp.dot(x, seg, preferred_element_type=jnp.float32,
                      precision=lax.Precision.HIGHEST)
    mean = seg_sum * jnp.float32(1.0 / d_model)
    xc = x - mean
    sq_sum = jnp.dot(xc * xc, seg, preferred_element_type=jnp.float32,
                     precision=lax.Precision.HIGHEST)
    var = sq_sum * jnp.float32(1.0 / (d_model - 1))
    std = jnp.sqrt(var)
    inv = pl.reciprocal(std + jnp.float32(eps), approx=approx)
    alpha = alpha_ref[...].astype(jnp.float32)
    bias = bias_ref[...].astype(jnp.float32)
    o_ref[...] = (xc * inv * alpha + bias).astype(o_ref.dtype)


def _sublane(dtype):
    # min sublane multiple for the second-to-last block dim
    return {4: 8, 2: 16, 1: 32}.get(jnp.dtype(dtype).itemsize, 8)


def _round_up(x, m):
    return (x + m - 1) // m * m


def norm_forward(x, alpha, bias, eps=1e-6, row_tile=None, approx_reciprocal=False):
    """Pallas TPU forward of MOFormer Norm."""
    orig_shape = x.shape
    d_model = orig_shape[-1]
    rows = math.prod(orig_shape[:-1])
    sub = _sublane(x.dtype)

    # ---- layout: fold logical rows into lane-dense 128-wide rows when d_model < 128 ----
    fold = (1 < d_model < _LANE and _LANE % d_model == 0
            and rows % (_LANE // d_model) == 0)
    if fold:
        k = _LANE // d_model
        d_eff = _LANE
        rows_eff = rows // k
        x2 = x.reshape(rows_eff, d_eff)
        alpha2 = jnp.tile(alpha.reshape(-1), (k,)).reshape(1, d_eff)
        bias2 = jnp.tile(bias.reshape(-1), (k,)).reshape(1, d_eff)
        lane_seg = jnp.arange(d_eff, dtype=jnp.int32) // d_model
        seg = (lane_seg[:, None] == lane_seg[None, :]).astype(jnp.float32)
    else:
        d_eff = d_model
        rows_eff = rows
        x2 = x.reshape(rows_eff, d_eff)
        alpha2 = alpha.reshape(1, d_eff)
        bias2 = bias.reshape(1, d_eff)

    # ---- row-tile selection: big, sublane-aligned, cdiv grid (no shrink-to-1 loop) ----
    if row_tile is None:
        target_tile_bytes = 2 * 1024 * 1024           # x tile in f32; in+out double-buffered
        tr = target_tile_bytes // (d_eff * 4)          #   stays well under 32 MiB scoped VMEM
        tr = max(sub, min(2048, (tr // sub) * sub))
    else:
        tr = max(sub, _round_up(row_tile, sub))
    tr = min(tr, _round_up(rows_eff, sub))
    # Keep >= 2 grid steps when there is enough work so v7x's 2 TensorCores both get work.
    if pl.cdiv(rows_eff, tr) < 2 and rows_eff >= 2 * sub:
        tr = _round_up(pl.cdiv(rows_eff, 2), sub)

    grid = (pl.cdiv(rows_eff, tr),)   # ragged last block is fine: the reduction is per-row,
                                      # padded rows are never written back.

    if fold:
        kernel = functools.partial(_norm_kernel_folded, eps=eps, d_model=d_model,
                                   approx=approx_reciprocal)
        in_specs = [
            pl.BlockSpec((tr, d_eff), lambda i: (i, 0)),
            pl.BlockSpec((d_eff, d_eff), lambda i: (0, 0)),
            pl.BlockSpec((1, d_eff), lambda i: (0, 0)),
            pl.BlockSpec((1, d_eff), lambda i: (0, 0)),
        ]
        operands = (x2, seg, alpha2, bias2)
    else:
        kernel = functools.partial(_norm_kernel_rowwise, eps=eps, d_model=d_model,
                                   approx=approx_reciprocal)
        in_specs = [
            pl.BlockSpec((tr, d_eff), lambda i: (i, 0)),
            pl.BlockSpec((1, d_eff), lambda i: (0, 0)),
            pl.BlockSpec((1, d_eff), lambda i: (0, 0)),
        ]
        operands = (x2, alpha2, bias2)

    out2 = pl.pallas_call(
        kernel,
        out_shape=jax.ShapeDtypeStruct((rows_eff, d_eff), x.dtype),
        grid_spec=pl.GridSpec(
            grid=grid,
            in_specs=in_specs,
            out_specs=pl.BlockSpec((tr, d_eff), lambda i: (i, 0)),
        ),
        compiler_params=pltpu.CompilerParams(
            dimension_semantics=("parallel",),
            vmem_limit_bytes=32 * 1024 * 1024,   # fits physical VMEM on v5e/v6e/v7x
        ),
    )(*operands)

    return out2.reshape(orig_shape)


if __name__ == "__main__":
    def norm_ref(x, alpha, bias, eps):
        d = x.shape[-1]
        mean = jnp.mean(x, axis=-1, keepdims=True)
        std = jnp.sqrt(jnp.sum((x - mean) ** 2, axis=-1, keepdims=True) / (d - 1))
        return alpha * (x - mean) / (std + eps) + bias

    key = jax.random.PRNGKey(0)

    # Primary demo shape (exercises the folded, lane-dense path: d_model=32 < 128).
    batch, seq, d_model = 2, 8, 32
    alpha = jnp.ones((d_model,), dtype=jnp.float32)   # nn.Parameter(torch.ones(d_model))
    bias = jnp.zeros((d_model,), dtype=jnp.float32)   # nn.Parameter(torch.zeros(d_model))
    x = jax.random.normal(key, (batch, seq, d_model), dtype=jnp.float32)

    out = jax.block_until_ready(norm_forward(x, alpha, bias, eps=1e-6))
    ref = norm_ref(x, alpha, bias, 1e-6)
    assert out.shape == x.shape
    assert jnp.allclose(out, ref, atol=1e-4, rtol=1e-4), \
        float(jnp.max(jnp.abs(out - ref)))

    # Secondary shape (exercises the row-wise path and the ragged cdiv last block).
    b2, s2, d2 = 3, 5, 128
    alpha_b = jax.random.normal(jax.random.PRNGKey(1), (d2,), dtype=jnp.float32)
    bias_b = jax.random.normal(jax.random.PRNGKey(2), (d2,), dtype=jnp.float32)
    x_b = jax.random.normal(jax.random.PRNGKey(3), (b2, s2, d2), dtype=jnp.float32)
    out_b = jax.block_until_ready(norm_forward(x_b, alpha_b, bias_b, eps=1e-6))
    ref_b = norm_ref(x_b, alpha_b, bias_b, 1e-6)
    assert jnp.allclose(out_b, ref_b, atol=1e-4, rtol=1e-4), \
        float(jnp.max(jnp.abs(out_b - ref_b)))

    print("KERNEL_OK")
</pallas_src>

<mosaic_0001>
module attributes {stable_mosaic.version = 11 : i64} {
  func.func @_norm_kernel_folded(%arg0: i32, %arg1: memref<8x128xf32, #tpu.memory_space<vmem>>, %arg2: memref<128x128xf32, #tpu.memory_space<vmem>>, %arg3: memref<1x128xf32, #tpu.memory_space<vmem>>, %arg4: memref<1x128xf32, #tpu.memory_space<vmem>>, %arg5: memref<8x128xf32, #tpu.memory_space<vmem>>) attributes {dimension_semantics = [#tpu.dimension_semantics<parallel>], iteration_bounds = array<i64: 1>, scalar_prefetch = 0 : i64, scratch_operands = 0 : i64, tpu.core_type = #tpu.core_type<tc>, window_params = [{transform_indices = @transform_0, window_bounds = array<i64: 8, 128>}, {pipeline_mode = #tpu.pipeline_mode<synchronous>, transform_indices = @transform_1, window_bounds = array<i64: 128, 128>}, {pipeline_mode = #tpu.pipeline_mode<synchronous>, transform_indices = @transform_2, window_bounds = array<i64: 1, 128>}, {pipeline_mode = #tpu.pipeline_mode<synchronous>, transform_indices = @transform_3, window_bounds = array<i64: 1, 128>}, {transform_indices = @transform_4, window_bounds = array<i64: 8, 128>}]} {
    %c0 = arith.constant 0 : index
    %c0_0 = arith.constant 0 : index
    %0 = vector.load %arg1[%c0, %c0_0] : memref<8x128xf32, #tpu.memory_space<vmem>>, vector<8x128xf32>
    %c0_1 = arith.constant 0 : index
    %c0_2 = arith.constant 0 : index
    %1 = vector.load %arg2[%c0_1, %c0_2] : memref<128x128xf32, #tpu.memory_space<vmem>>, vector<128x128xf32>
    %cst = arith.constant dense<0.000000e+00> : vector<8x128xf32>
    %2 = tpu.matmul %0, %1, %cst {dimension_numbers = #tpu.dot_dimension_numbers<[1], [0], [0], [1], [0, 0, 1, 1], [], []>, precision = #tpu.contract_precision<fp32>} : vector<8x128xf32>, vector<128x128xf32>, vector<8x128xf32> -> vector<8x128xf32>
    %cst_3 = arith.constant 3.125000e-02 : f32
    %3 = vector.broadcast %cst_3 : f32 to vector<8x128xf32>
    %4 = arith.mulf %2, %3 : vector<8x128xf32>
    %5 = arith.subf %0, %4 : vector<8x128xf32>
    %6 = arith.mulf %5, %5 : vector<8x128xf32>
    %cst_4 = arith.constant dense<0.000000e+00> : vector<8x128xf32>
    %7 = tpu.matmul %6, %1, %cst_4 {dimension_numbers = #tpu.dot_dimension_numbers<[1], [0], [0], [1], [0, 0, 1, 1], [], []>, precision = #tpu.contract_precision<fp32>} : vector<8x128xf32>, vector<128x128xf32>, vector<8x128xf32> -> vector<8x128xf32>
    %cst_5 = arith.constant 0.0322580636 : f32
    %8 = vector.broadcast %cst_5 : f32 to vector<8x128xf32>
    %9 = arith.mulf %7, %8 : vector<8x128xf32>
    %10 = math.sqrt %9 : vector<8x128xf32>
    %cst_6 = arith.constant 9.99999997E-7 : f32
    %11 = vector.broadcast %cst_6 : f32 to vector<8x128xf32>
    %12 = arith.addf %10, %11 : vector<8x128xf32>
    %13 = tpu.reciprocal %12 : vector<8x128xf32> -> vector<8x128xf32>
    %c0_7 = arith.constant 0 : index
    %c0_8 = arith.constant 0 : index
    %14 = vector.load %arg3[%c0_7, %c0_8] : memref<1x128xf32, #tpu.memory_space<vmem>>, vector<1x128xf32>
    %c0_9 = arith.constant 0 : index
    %c0_10 = arith.constant 0 : index
    %15 = vector.load %arg4[%c0_9, %c0_10] : memref<1x128xf32, #tpu.memory_space<vmem>>, vector<1x128xf32>
    %16 = arith.mulf %5, %13 : vector<8x128xf32>
    %17 = vector.broadcast %14 : vector<1x128xf32> to vector<8x128xf32>
    %18 = arith.mulf %16, %17 : vector<8x128xf32>
    %19 = vector.broadcast %15 : vector<1x128xf32> to vector<8x128xf32>
    %20 = arith.addf %18, %19 : vector<8x128xf32>
    %c0_11 = arith.constant 0 : index
    %c0_12 = arith.constant 0 : index
    %21 = vector.load %arg5[%c0_11, %c0_12] : memref<8x128xf32, #tpu.memory_space<vmem>>, vector<8x128xf32>
    tpu.vector_store %arg5[%c0_11, %c0_12], %20 {strides = array<i32>} : memref<8x128xf32, #tpu.memory_space<vmem>>, vector<8x128xf32>,
    return
  }
  func.func @transform_0(%arg0: i32) -> (i32, i32) {
    %c0_i32 = arith.constant 0 : i32
    %c0_i32_0 = arith.constant 0 : i32
    return %arg0, %c0_i32 : i32, i32
  }
  func.func @transform_1(%arg0: i32) -> (i32, i32) {
    %c0_i32 = arith.constant 0 : i32
    %c0_i32_0 = arith.constant 0 : i32
    %c0_i32_1 = arith.constant 0 : i32
    return %c0_i32, %c0_i32_0 : i32, i32
  }
  func.func @transform_2(%arg0: i32) -> (i32, i32) {
    %c0_i32 = arith.constant 0 : i32
    %c0_i32_0 = arith.constant 0 : i32
    %c0_i32_1 = arith.constant 0 : i32
    return %c0_i32, %c0_i32_0 : i32, i32
  }
  func.func @transform_3(%arg0: i32) -> (i32, i32) {
    %c0_i32 = arith.constant 0 : i32
    %c0_i32_0 = arith.constant 0 : i32
    %c0_i32_1 = arith.constant 0 : i32
    return %c0_i32, %c0_i32_0 : i32, i32
  }
  func.func @transform_4(%arg0: i32) -> (i32, i32) {
    %c0_i32 = arith.constant 0 : i32
    %c0_i32_0 = arith.constant 0 : i32
    return %arg0, %c0_i32 : i32, i32
  }
}

</mosaic_0001>

<bundles_post_ra>
// kernel: tpu_custom_call.1
= control target key start
LH: loop header
LB: loop body
LE: loop exit
PB: predicated region body
PF: predicated region fallthrough
CT: control target
= control target key end

     0   :  { %9 = vsyncpa [#allocation3], 0  ;;  %s2790_s0 = inlined_call_operand.hbm [shape: f32[4,128], index: 0, kind: input, shape index: {}]   ;;  %s2791_s1 = inlined_call_operand.hbm [shape: f32[128,128], index: 1, kind: input, shape index: {}]   ;;  %s2792_s2 = inlined_call_operand.vmem [shape: f32[1,128], index: 2, kind: input, shape index: {}]   ;;  %s2793_s3 = inlined_call_operand.vmem [shape: f32[1,128], index: 3, kind: input, shape index: {}]   ;;  %s2794_s4 = inlined_call_operand.hbm [shape: f32[4,128], index: 4, kind: output, shape index: {}]  }
   0x1   :  { %10 = vsyncpa [#allocation6], 0 }
   0x2   :  { %11 = vsyncpa [#allocation4], 0 }
   0x3   :  { %16 = vsyncadd [#allocation3], 64  ;;  %s2099_s15 = smov [#allocation2]  }
   0x4   :  { %s17_s16 = sshll.u32 %s2099_s15, 4  ;;  %s18_s16 = int_to_ptr.vmem [resolvable:$true] %s17_s16 }
   0x5   :  { %s2041_s17 = scalar_lea.vmem %s18_s16, 64  ;;  %s2045_s18 = scalar_lea.vmem %s18_s16, 128 }
   0x6   :  { %p2042_p0 = scmp.ne.s32.totalorder %s18_s16, %s2041_s17  ;;  %p2046_p1 = scmp.lt.s32.totalorder %s18_s16, %s18_s16 }
   0x7   :  { %p2047_p2 = scmp.lt.s32.totalorder %s2045_s18, %s2041_s17 }
   0x9   :  { %p2048_p3 = por %p2047_p2, %p2046_p1 }
   0xb   :  { %p2049_p4 = pnand %p2048_p3, %p2042_p0 }
   0xd   :  { %2052 = shalt.err (!%p2049_p4)
}
   0xe   :  { %s2100_s19 = smov 64   ;;  %s2101_s20 = smov 4  }
   0xf   :  { %23 = dma.hbm_to_vmem [thread:$0]  %s2790_s0, 64, %s18_s16, [#allocation3], %s2100_s19, %s2100_s19, %s2101_s20  }
  0x10   :  { %s2102_s23 = smov [#allocation5]  }
  0x11   :  { %s29_s24 = sshll.u32 %s2102_s23, 4  ;;  %s30_s24 = int_to_ptr.vmem [resolvable:$true] %s29_s24 }
  0x12   :  { %s2061_s25 = scalar_lea.vmem %s30_s24, 2048  ;;  %p2066_p6 = scmp.lt.s32.totalorder %s30_s24, %s30_s24 }
  0x13   :  { %p2062_p5 = scmp.ne.s32.totalorder %s30_s24, %s2061_s25  ;;  %p2067_p7 = scmp.lt.s32.totalorder %s2061_s25, %s2061_s25 }
  0x15   :  { %p2068_p8 = por %p2067_p7, %p2066_p6 }
  0x17   :  { %p2069_p9 = pnand %p2068_p8, %p2062_p5 }
  0x19   :  { %2072 = shalt.err (!%p2069_p9)
}
  0x1a   :  { %s2103_s26 = smov 128   ;;  %s2104_s27 = smov 8  }
  0x1b   :  { %35 = dma.hbm_to_vmem [thread:$0]  %s2791_s1, 2048, %s30_s24, [#allocation6], %s2103_s26, %s2103_s26, %s2104_s27  }
  0x1c   :  { %2093 = dma.done.wait [#allocation3], 128  }
  0x1d   :  { %2094 = vsyncadd [#allocation3], 4294967168 }
  0x1e   :  { %2095 = dma.done.wait [#allocation6], 2048  }
  0x1f   :  { %2096 = vsyncadd [#allocation6], 4294965248  ;;  %v2807_v0 = vmov 0.0   ;;  %vm2106_vm0 = vmmov 0   ;;  %v62_v1 = vld [vmem:[#allocation5 + $0x78] sm:$0xff]  ;;  %v61_v2 = vld [vmem:[#allocation5 + $0x70] sm:$0xff] }
  0x20   :  { %1600 = vmatprep.subr.mxu0 %v2807_v0  ;;  %1635 = vmatprep.subr.mxu1 %v2807_v0  ;;  %v60_v3 = vld [vmem:[#allocation5 + $0x68] sm:$0xff]  ;;  %v2148_v4 = vand.u32 4294901760, %v62_v1  ;;  %v2150_v5 = vand.u32 4294901760, %v61_v2  ;;  %v59_v7 = vld [vmem:[#allocation5 + $0x60] sm:$0xff]  ;;  %v58_v8 = vld [vmem:[#allocation5 + $0x58] sm:$0xff] }
  0x21   :  { %1632 = vmatprep.mubr.msk.f32.mxu0 %vm2106_vm0, %v2807_v0  ;;  %1667 = vmatprep.mubr.msk.f32.mxu1 %vm2106_vm0, %v2807_v0  ;;  %v2152_v6 = vand.u32 4294901760, %v60_v3  ;;  %v57_v9 = vld [vmem:[#allocation5 + $0x50] sm:$0xff]  ;;  %v2154_v10 = vand.u32 4294901760, %v59_v7  ;;  %v2156_v11 = vand.u32 4294901760, %v58_v8  ;;  %v56_v13 = vld [vmem:[#allocation5 + $0x48] sm:$0xff]  ;;  %v55_v14 = vld [vmem:[#allocation5 + $0x40] sm:$0xff] }
  0x22   :  { %v2158_v12 = vand.u32 4294901760, %v57_v9  ;;  %1601 = vmatpush3.msra.mxu0 %v2148_v4  ;;  %v2162_v15 = vsub.f32 %v62_v1, %v2148_v4  ;;  %v2165_v16 = vsub.f32 %v61_v2, %v2150_v5  ;;  %v2167_v17 = vand.u32 4294901760, %v56_v13  ;;  %v54_v19 = vld [vmem:[#allocation5 + $0x38] sm:$0xff]  ;;  %v53_v26 = vld [vmem:[#allocation5 + $0x30] sm:$0xff]  ;;  %v52_v36 = vld [vmem:[#allocation5 + $0x28] sm:$0xff] }
  0x23   :  { %v2170_v18 = vsub.f32 %v60_v3, %v2152_v6  ;;  %1602 = vmatprep.subr.mxu0 %v2807_v0  ;;  %v2174_v20 = vsub.f32 %v59_v7, %v2154_v10  ;;  %v2177_v21 = vsub.f32 %v58_v8, %v2156_v11  ;;  %v2189_v25 = vand.u32 4294901760, %v55_v14  ;;  %v51_v41 = vld [vmem:[#allocation5 + $0x20] sm:$0xff]  ;;  %v50_v49 = vld [vmem:[#allocation5 + $0x18] sm:$0xff]  ;;  %v49_v54 = vld [vmem:[#allocation5 + $0x10] sm:$0xff] }
  0x24   :  { %1603 = vmatpush3.msra.mxu0 %v2150_v5  ;;  %v2181_v22 = vand.u32 4294901760, %v2162_v15  ;;  %v2184_v23 = vand.u32 4294901760, %v2165_v16  ;;  %v2195_v28 = vand.u32 4294901760, %v54_v19  ;;  %v2201_v30 = vsub.f32 %v57_v9, %v2158_v12  ;;  %v2248_v50 = vld [vmem:[#allocation2] sm:$0xff]  ;;  %v48_v60 = vld [vmem:[#allocation5 + $0x8] sm:$0xff]  ;;  %v47_v7 = vld [vmem:[#allocation5] sm:$0xff] }
  0x25   :  { %v2187_v24 = vand.u32 4294901760, %v2170_v18  ;;  %1604 = vmatprep.subr.mxu0 %v2807_v0  ;;  %v2193_v27 = vand.u32 4294901760, %v2174_v20  ;;  %v2198_v29 = vand.u32 4294901760, %v2177_v21  ;;  %v2211_v34 = vsub.f32 %v56_v13, %v2167_v17  ;;  %2809 = vst [vmem:[#allocation11_spill] sm:$0xff] %v2248_v50 }
  0x26   :  { %1605 = vmatpush3.msra.mxu0 %v2152_v6  ;;  %v158_v31 = vsub.f32 %v2162_v15, %v2181_v22  ;;  %v165_v32 = vsub.f32 %v2165_v16, %v2184_v23  ;;  %v2214_v35 = vand.u32 4294901760, %v53_v26  ;;  %v2224_v40 = vand.u32 4294901760, %v2201_v30 }
  0x27   :  { %v172_v33 = vsub.f32 %v2170_v18, %v2187_v24  ;;  %1606 = vmatprep.subr.mxu0 %v2807_v0  ;;  %v179_v39 = vsub.f32 %v2174_v20, %v2193_v27  ;;  %v186_v42 = vsub.f32 %v2177_v21, %v2198_v29  ;;  %v2230_v43 = vsub.f32 %v55_v14, %v2189_v25 }
  0x28   :  { %1607 = vmatpush3.msra.mxu0 %v2154_v10  ;;  %v2217_v37 = vand.u32 4294901760, %v158_v31  ;;  %v2219_v38 = vand.u32 4294901760, %v165_v32  ;;  %v2236_v45 = vand.u32 4294901760, %v52_v36  ;;  %v2239_v46 = vand.u32 4294901760, %v2211_v34 }
  0x29   :  { %1608 = vmatprep.subr.mxu0 %v2807_v0  ;;  %v2234_v44 = vand.u32 4294901760, %v172_v33  ;;  %v2242_v47 = vsub.f32 %v54_v19, %v2195_v28  ;;  %v2246_v48 = vand.u32 4294901760, %v51_v41  ;;  %v2252_v51 = vand.u32 4294901760, %v179_v39 }
  0x2a   :  { %1609 = vmatpush3.msra.mxu0 %v2156_v11  ;;  %1636 = vmatpush3.msra.mxu1 %v2217_v37  ;;  %v193_v52 = vsub.f32 %v2201_v30, %v2224_v40  ;;  %v2257_v53 = vand.u32 4294901760, %v2230_v43  ;;  %v2260_v55 = vsub.f32 %v53_v26, %v2214_v35  ;;  %v2264_v56 = vand.u32 4294901760, %v186_v42 }
  0x2b   :  { %1610 = vmatprep.subr.mxu0 %v2807_v0  ;;  %1637 = vmatprep.subr.mxu1 %v2807_v0  ;;  %2810 = vst [vmem:[#allocation12_spill] sm:$0xff] %v2252_v51  ;;  %v2267_v57 = vand.u32 4294901760, %v2242_v47  ;;  %v200_v58 = vsub.f32 %v2211_v34, %v2239_v46  ;;  %v2273_v59 = vand.u32 4294901760, %v50_v49  ;;  %v2276_v61 = vsub.f32 %v52_v36, %v2236_v45 }
  0x2c   :  { %1611 = vmatpush3.msra.mxu0 %v2158_v12  ;;  %1638 = vmatpush3.msra.mxu1 %v2219_v38  ;;  %2811 = vst [vmem:[#allocation13_spill] sm:$0xff] %v2264_v56  ;;  %v2279_v62 = vand.u32 4294901760, %v2248_v50  ;;  %v2283_v63 = vand.u32 4294901760, %v49_v54  ;;  %v2287_v1 = vand.u32 4294901760, %v193_v52  ;;  %v207_v2 = vsub.f32 %v2230_v43, %v2257_v53 }
  0x2d   :  { %1612 = vmatprep.subr.mxu0 %v2807_v0  ;;  %1639 = vmatprep.subr.mxu1 %v2807_v0  ;;  %v2292_v3 = vand.u32 4294901760, %v2260_v55  ;;  %v2295_v8 = vsub.f32 %v51_v41, %v2246_v48  ;;  %v214_v9 = vsub.f32 %v2242_v47, %v2267_v57  ;;  %v2301_v13 = vand.u32 4294901760, %v48_v60 }
  0x2e   :  { %1613 = vmatpush3.msra.mxu0 %v2167_v17  ;;  %1640 = vmatpush3.msra.mxu1 %v2234_v44  ;;  %2812 = vst [vmem:[#allocation14_spill] sm:$0xff] %v2287_v1  ;;  %v2305_v14 = vand.u32 4294901760, %v200_v58  ;;  %v2308_v19 = vand.u32 4294901760, %v2276_v61  ;;  %v2312_v26 = vsub.f32 %v2248_v50, %v2279_v62  ;;  %v2315_v31 = vsub.f32 %v50_v49, %v2273_v59 }
  0x2f   :  { %1614 = vmatprep.subr.mxu0 %v2807_v0  ;;  %1641 = vmatprep.subr.mxu1 %v2807_v0  ;;  %v2319_v32 = vand.u32 4294901760, %v47_v7  ;;  %v2323_v33 = vand.u32 4294901760, %v207_v2  ;;  %v221_v36 = vsub.f32 %v2260_v55, %v2292_v3  ;;  %v2328_v39 = vand.u32 4294901760, %v2295_v8 }
  0x30   :  { %1615 = vmatpush3.msra.mxu0 %v2189_v25  ;;  %1642 = vmatpush3.msra.mxu1 %v2252_v51  ;;  %2813 = vst [vmem:[#allocation15_spill] sm:$0xff] %v2305_v14  ;;  %v2331_v41 = vsub.f32 %v49_v54, %v2283_v63  ;;  %v2335_v42 = vand.u32 4294901760, %v214_v9  ;;  %v228_v49 = vsub.f32 %v2276_v61, %v2308_v19  ;;  %v2343_v58 = vand.u32 4294901760, %v2315_v31 }
  0x31   :  { %1616 = vmatprep.subr.mxu0 %v2807_v0  ;;  %1643 = vmatprep.subr.mxu1 %v2807_v0  ;;  %2814 = vst [vmem:[#allocation16_spill] sm:$0xff] %v2323_v33  ;;  %v2346_v54 = vsub.f32 %v48_v60, %v2301_v13  ;;  %v2352_v2 = vand.u32 4294901760, %v221_v36  ;;  %v235_v9 = vsub.f32 %v2295_v8, %v2328_v39  ;;  %v2819_v36 = vand.u32 4294901760, %v2312_v26 }
  0x32   :  { %1617 = vmatpush3.msra.mxu0 %v2195_v28  ;;  %1644 = vmatpush3.msra.mxu1 %v2264_v56  ;;  %2815 = vst [vmem:[#allocation17_spill] sm:$0xff] %v2335_v42  ;;  %2816 = vst [vmem:[#allocation18_spill] sm:$0xff] %v2343_v58  ;;  %v2357_v52 = vand.u32 4294901760, %v2331_v41  ;;  %v2360_v50 = vsub.f32 %v47_v7, %v2319_v32  ;;  %v2366_v60 = vand.u32 4294901760, %v228_v49 }
  0x33   :  { %1618 = vmatprep.subr.mxu0 %v2807_v0  ;;  %1645 = vmatprep.subr.mxu1 %v2807_v0  ;;  %2817 = vst [vmem:[#allocation19_spill] sm:$0xff] %v2352_v2  ;;  %v2374_v7 = vand.u32 4294901760, %v2346_v54  ;;  %v2380_v49 = vand.u32 4294901760, %v235_v9 }
  0x34   :  { %1619 = vmatpush3.msra.mxu0 %v2214_v35  ;;  %1646 = vmatpush3.msra.mxu1 %v2287_v1  ;;  %2818 = vst [vmem:[#allocation20_spill] sm:$0xff] %v2357_v52 }
  0x35   :  { %1620 = vmatprep.subr.mxu0 %v2807_v0  ;;  %1647 = vmatprep.subr.mxu1 %v2807_v0  ;;  %2820 = vst [vmem:[#allocation21_spill] sm:$0xff] %v2374_v7  ;;  %v256_v9 = vsub.f32 %v2346_v54, %v2374_v7 }
  0x36   :  { %1621 = vmatpush3.msra.mxu0 %v2236_v45  ;;  %1648 = vmatpush3.msra.mxu1 %v2305_v14  ;;  %v242_v14 = vsub.f32 %v2315_v31, %v2343_v58 }
  0x37   :  { %1622 = vmatprep.subr.mxu0 %v2807_v0  ;;  %1649 = vmatprep.subr.mxu1 %v2807_v0 }
  0x38   :  { %1623 = vmatpush3.msra.mxu0 %v2246_v48  ;;  %1650 = vmatpush3.msra.mxu1 %v2323_v33  ;;  %v147_v33 = vsub.f32 %v2312_v26, %v2819_v36  ;;  %v2385_v36 = vand.u32 4294901760, %v2360_v50  ;;  %v2391_v56 = vand.u32 4294901760, %v242_v14  ;;  %v2406_v14 = vand.u32 4294901760, %v256_v9 }
  0x39   :  { %1624 = vmatprep.subr.mxu0 %v2807_v0  ;;  %1651 = vmatprep.subr.mxu1 %v2807_v0 }
  0x3a   :  { %1625 = vmatpush3.msra.mxu0 %v2273_v59  ;;  %1652 = vmatpush3.msra.mxu1 %v2335_v42  ;;  %v249_v42 = vsub.f32 %v2331_v41, %v2357_v52  ;;  %2821 = vst [vmem:[#allocation22_spill] sm:$0xff] %v2385_v36  ;;  %v148_v1 = vand.u32 4294901760, %v147_v33  ;;  %v263_v51 = vsub.f32 %v2360_v50, %v2385_v36 }
  0x3b   :  { %1626 = vmatprep.subr.mxu0 %v2807_v0  ;;  %1653 = vmatprep.subr.mxu1 %v2807_v0 }
  0x3c   :  { %1627 = vmatpush3.msra.mxu0 %v2283_v63  ;;  %1654 = vmatpush3.msra.mxu1 %v2352_v2  ;;  %v2399_v2 = vand.u32 4294901760, %v249_v42  ;;  %v2412_v33 = vand.u32 4294901760, %v263_v51  ;;  %v2822_v51 = vand.u32 4294901760, %v2312_v26  ;;  %v2829_v42 = vld [vmem:[#allocation19_spill] sm:$0xff] }
  0x3d   :  { %1628 = vmatprep.subr.mxu0 %v2807_v0  ;;  %1655 = vmatprep.subr.mxu1 %v2807_v0 }
  0x3e   :  { %1629 = vmatpush3.msra.mxu0 %v2301_v13  ;;  %1656 = vmatpush3.msra.mxu1 %v2366_v60 }
  0x3f   :  { %1630 = vmatprep.subr.mxu0 %v2807_v0  ;;  %1657 = vmatprep.subr.mxu1 %v2807_v0 }
  0x40   :  { %1631 = vmatpush3.msra.mxu0 %v2319_v32  ;;  %1658 = vmatpush3.msra.mxu1 %v2380_v49 }
  0x41   :  { %1659 = vmatprep.subr.mxu1 %v2807_v0  ;;  %1670 = vmatprep.subr.mxu0 %v2807_v0 }
  0x42   :  { %1633 = vmatmul.mubr.f32.vlgmr.msra.gmra.mxu0 %v148_v1  ;;  %1660 = vmatpush3.msra.mxu1 %v2391_v56  ;;  %v2827_v1 = vld [vmem:[#allocation16_spill] sm:$0xff] }
  0x43   :  { %1671 = vmatpush3.msra.mxu0 %v2162_v15  ;;  %1661 = vmatprep.subr.mxu1 %v2807_v0 }
  0x44   :  { %1672 = vmatprep.subr.mxu0 %v2807_v0  ;;  %1662 = vmatpush3.msra.mxu1 %v2399_v2 }
  0x45   :  { %1673 = vmatpush3.msra.mxu0 %v2165_v16  ;;  %1663 = vmatprep.subr.mxu1 %v2807_v0 }
  0x46   :  { %1674 = vmatprep.subr.mxu0 %v2807_v0  ;;  %1664 = vmatpush3.msra.mxu1 %v2406_v14 }
  0x47   :  { %1675 = vmatpush3.msra.mxu0 %v2170_v18  ;;  %1665 = vmatprep.subr.mxu1 %v2807_v0 }
  0x48   :  { %1676 = vmatprep.subr.mxu0 %v2807_v0  ;;  %1666 = vmatpush3.msra.mxu1 %v2412_v33 }
  0x49   :  { %1677 = vmatpush3.msra.mxu0 %v2174_v20  ;;  %1668 = vmatmul.mubr.f32.vlgmr.msra.gmra.mxu1 %v2279_v62 }
  0x4a   :  { %1678 = vmatprep.subr.mxu0 %v2807_v0  ;;  %1705 = vmatprep.subr.mxu1 %v2807_v0 }
  0x4b   :  { %1679 = vmatpush3.msra.mxu0 %v2177_v21  ;;  %1706 = vmatpush3.msra.mxu1 %v2148_v4 }
  0x4c   :  { %1680 = vmatprep.subr.mxu0 %v2807_v0  ;;  %1707 = vmatprep.subr.mxu1 %v2807_v0 }
  0x4d   :  { %1681 = vmatpush3.msra.mxu0 %v2201_v30  ;;  %1708 = vmatpush3.msra.mxu1 %v2150_v5 }
  0x4e   :  { %1682 = vmatprep.subr.mxu0 %v2807_v0  ;;  %1709 = vmatprep.subr.mxu1 %v2807_v0 }
  0x4f   :  { %1683 = vmatpush3.msra.mxu0 %v2211_v34  ;;  %1710 = vmatpush3.msra.mxu1 %v2152_v6 }
  0x50   :  { %1684 = vmatprep.subr.mxu0 %v2807_v0  ;;  %1711 = vmatprep.subr.mxu1 %v2807_v0 }
  0x51   :  { %1685 = vmatpush3.msra.mxu0 %v2230_v43  ;;  %1712 = vmatpush3.msra.mxu1 %v2154_v10 }
  0x52   :  { %1686 = vmatprep.subr.mxu0 %v2807_v0  ;;  %1713 = vmatprep.subr.mxu1 %v2807_v0 }
  0x53   :  { %1687 = vmatpush3.msra.mxu0 %v2242_v47  ;;  %1714 = vmatpush3.msra.mxu1 %v2156_v11 }
  0x54   :  { %1688 = vmatprep.subr.mxu0 %v2807_v0  ;;  %1715 = vmatprep.subr.mxu1 %v2807_v0 }
  0x55   :  { %1689 = vmatpush3.msra.mxu0 %v2260_v55  ;;  %1716 = vmatpush3.msra.mxu1 %v2158_v12 }
  0x56   :  { %1690 = vmatprep.subr.mxu0 %v2807_v0  ;;  %1717 = vmatprep.subr.mxu1 %v2807_v0 }
  0x57   :  { %1691 = vmatpush3.msra.mxu0 %v2276_v61  ;;  %1718 = vmatpush3.msra.mxu1 %v2167_v17 }
  0x58   :  { %1692 = vmatprep.subr.mxu0 %v2807_v0  ;;  %1719 = vmatprep.subr.mxu1 %v2807_v0 }
  0x59   :  { %1693 = vmatpush3.msra.mxu0 %v2295_v8  ;;  %1720 = vmatpush3.msra.mxu1 %v2189_v25 }
  0x5a   :  { %1694 = vmatprep.subr.mxu0 %v2807_v0  ;;  %1721 = vmatprep.subr.mxu1 %v2807_v0 }
  0x5b   :  { %1695 = vmatpush3.msra.mxu0 %v2315_v31  ;;  %1722 = vmatpush3.msra.mxu1 %v2195_v28 }
  0x5c   :  { %1696 = vmatprep.subr.mxu0 %v2807_v0  ;;  %1723 = vmatprep.subr.mxu1 %v2807_v0 }
  0x5d   :  { %1697 = vmatpush3.msra.mxu0 %v2331_v41  ;;  %1724 = vmatpush3.msra.mxu1 %v2214_v35 }
  0x5e   :  { %1698 = vmatprep.subr.mxu0 %v2807_v0  ;;  %1725 = vmatprep.subr.mxu1 %v2807_v0 }
  0x5f   :  { %1699 = vmatpush3.msra.mxu0 %v2346_v54  ;;  %1726 = vmatpush3.msra.mxu1 %v2236_v45 }
  0x60   :  { %1700 = vmatprep.subr.mxu0 %v2807_v0  ;;  %1727 = vmatprep.subr.mxu1 %v2807_v0 }
  0x61   :  { %1701 = vmatpush3.msra.mxu0 %v2360_v50  ;;  %1702 = vmatprep.mubr.msk.f32.mxu0 %vm2106_vm0, %v2807_v0 }
  0x62   :  { %1728 = vmatpush3.msra.mxu1 %v2246_v48  ;;  %1703 = vmatmul.mubr.f32.vlgmr.msra.gmra.mxu0 %v2312_v26  ;;  %v2828_v26 = vld [vmem:[#allocation17_spill] sm:$0xff] }
  0x63   :  { %1729 = vmatprep.subr.mxu1 %v2807_v0  ;;  %1740 = vmatprep.subr.mxu0 %v2807_v0 }
  0x64   :  { %1730 = vmatpush3.msra.mxu1 %v2273_v59  ;;  %1741 = vmatpush3.msra.mxu0 %v2181_v22 }
  0x65   :  { %1731 = vmatprep.subr.mxu1 %v2807_v0  ;;  %1742 = vmatprep.subr.mxu0 %v2807_v0 }
  0x66   :  { %1732 = vmatpush3.msra.mxu1 %v2283_v63  ;;  %1743 = vmatpush3.msra.mxu0 %v2184_v23 }
  0x67   :  { %1733 = vmatprep.subr.mxu1 %v2807_v0  ;;  %1744 = vmatprep.subr.mxu0 %v2807_v0 }
  0x68   :  { %1734 = vmatpush3.msra.mxu1 %v2301_v13  ;;  %1745 = vmatpush3.msra.mxu0 %v2187_v24 }
  0x69   :  { %1735 = vmatprep.subr.mxu1 %v2807_v0  ;;  %1746 = vmatprep.subr.mxu0 %v2807_v0 }
  0x6a   :  { %1736 = vmatpush3.msra.mxu1 %v2319_v32  ;;  %1737 = vmatprep.mubr.msk.f32.mxu1 %vm2106_vm0, %v2807_v0 }
  0x6b   :  { %1747 = vmatpush3.msra.mxu0 %v2193_v27  ;;  %1738 = vmatmul.mubr.f32.vlgmr.msra.gmra.mxu1 %v2822_v51 }
  0x6c   :  { %1748 = vmatprep.subr.mxu0 %v2807_v0  ;;  %1775 = vmatprep.subr.mxu1 %v2807_v0 }
  0x6d   :  { %1749 = vmatpush3.msra.mxu0 %v2198_v29  ;;  %1776 = vmatpush3.msra.mxu1 %v2148_v4 }
  0x6e   :  { %1750 = vmatprep.subr.mxu0 %v2807_v0  ;;  %1777 = vmatprep.subr.mxu1 %v2807_v0 }
  0x6f   :  { %1751 = vmatpush3.msra.mxu0 %v2224_v40  ;;  %1778 = vmatpush3.msra.mxu1 %v2150_v5 }
  0x70   :  { %1752 = vmatprep.subr.mxu0 %v2807_v0  ;;  %1779 = vmatprep.subr.mxu1 %v2807_v0 }
  0x71   :  { %1753 = vmatpush3.msra.mxu0 %v2239_v46  ;;  %1780 = vmatpush3.msra.mxu1 %v2152_v6 }
  0x72   :  { %1754 = vmatprep.subr.mxu0 %v2807_v0  ;;  %1781 = vmatprep.subr.mxu1 %v2807_v0 }
  0x73   :  { %1755 = vmatpush3.msra.mxu0 %v2257_v53  ;;  %1782 = vmatpush3.msra.mxu1 %v2154_v10 }
  0x74   :  { %1756 = vmatprep.subr.mxu0 %v2807_v0  ;;  %1783 = vmatprep.subr.mxu1 %v2807_v0 }
  0x75   :  { %1757 = vmatpush3.msra.mxu0 %v2267_v57  ;;  %1784 = vmatpush3.msra.mxu1 %v2156_v11 }
  0x76   :  { %1758 = vmatprep.subr.mxu0 %v2807_v0  ;;  %1785 = vmatprep.subr.mxu1 %v2807_v0 }
  0x77   :  { %1759 = vmatpush3.msra.mxu0 %v2292_v3  ;;  %1786 = vmatpush3.msra.mxu1 %v2158_v12 }
  0x78   :  { %1760 = vmatprep.subr.mxu0 %v2807_v0  ;;  %1787 = vmatprep.subr.mxu1 %v2807_v0 }
  0x79   :  { %1761 = vmatpush3.msra.mxu0 %v2308_v19  ;;  %1788 = vmatpush3.msra.mxu1 %v2167_v17 }
  0x7a   :  { %1762 = vmatprep.subr.mxu0 %v2807_v0  ;;  %1789 = vmatprep.subr.mxu1 %v2807_v0 }
  0x7b   :  { %1763 = vmatpush3.msra.mxu0 %v2328_v39  ;;  %1790 = vmatpush3.msra.mxu1 %v2189_v25 }
  0x7c   :  { %1764 = vmatprep.subr.mxu0 %v2807_v0  ;;  %1791 = vmatprep.subr.mxu1 %v2807_v0 }
  0x7d   :  { %1765 = vmatpush3.msra.mxu0 %v2343_v58  ;;  %1792 = vmatpush3.msra.mxu1 %v2195_v28  ;;  %v2830_v58 = vld [vmem:[#allocation11_spill] sm:$0xff] }
  0x7e   :  { %1766 = vmatprep.subr.mxu0 %v2807_v0  ;;  %1793 = vmatprep.subr.mxu1 %v2807_v0 }
  0x7f   :  { %1767 = vmatpush3.msra.mxu0 %v2357_v52  ;;  %1794 = vmatpush3.msra.mxu1 %v2214_v35 }
  0x80   :  { %1768 = vmatprep.subr.mxu0 %v2807_v0  ;;  %1795 = vmatprep.subr.mxu1 %v2807_v0 }
  0x81   :  { %1769 = vmatpush3.msra.mxu0 %v2374_v7  ;;  %1796 = vmatpush3.msra.mxu1 %v2236_v45 }
  0x82   :  { %1770 = vmatprep.subr.mxu0 %v2807_v0  ;;  %1797 = vmatprep.subr.mxu1 %v2807_v0 }
  0x83   :  { %1771 = vmatpush3.msra.mxu0 %v2385_v36  ;;  %1772 = vmatprep.mubr.msk.f32.mxu0 %vm2106_vm0, %v2807_v0 }
  0x84   :  { %1798 = vmatpush3.msra.mxu1 %v2246_v48  ;;  %1773 = vmatmul.mubr.f32.vlgmr.msra.gmra.mxu0 %v2279_v62 }
  0x85   :  { %1799 = vmatprep.subr.mxu1 %v2807_v0  ;;  %1807 = vmatprep.mubr.msk.f32.mxu1 %vm2106_vm0, %v2807_v0 }
  0x86   :  { %1800 = vmatpush3.msra.mxu1 %v2273_v59  ;;  %1810 = vmatprep.subr.mxu0 %v2807_v0 }
  0x87   :  { %1801 = vmatprep.subr.mxu1 %v2807_v0  ;;  %1811 = vmatpush3.msra.mxu0 %v2148_v4 }
  0x88   :  { %1802 = vmatpush3.msra.mxu1 %v2283_v63  ;;  %1812 = vmatprep.subr.mxu0 %v2807_v0 }
  0x89   :  { %1803 = vmatprep.subr.mxu1 %v2807_v0  ;;  %1813 = vmatpush3.msra.mxu0 %v2150_v5 }
  0x8a   :  { %1804 = vmatpush3.msra.mxu1 %v2301_v13  ;;  %1814 = vmatprep.subr.mxu0 %v2807_v0 }
  0x8b   :  { %1805 = vmatprep.subr.mxu1 %v2807_v0  ;;  %1815 = vmatpush3.msra.mxu0 %v2152_v6 }
  0x8c   :  { %1806 = vmatpush3.msra.mxu1 %v2319_v32  ;;  %1816 = vmatprep.subr.mxu0 %v2807_v0 }
  0x8d   :  { %1808 = vmatmul.mubr.f32.vlgmr.msra.gmra.mxu1 %v2279_v62  ;;  %1845 = vmatprep.subr.mxu1 %v2807_v0  ;;  %v2826_v62 = vld [vmem:[#allocation15_spill] sm:$0xff] }
  0x8e   :  { %1846 = vmatpush3.msra.mxu1 %v2217_v37  ;;  %1817 = vmatpush3.msra.mxu0 %v2154_v10  ;;  %v2823_v37 = vld [vmem:[#allocation12_spill] sm:$0xff] }
  0x8f   :  { %1847 = vmatprep.subr.mxu1 %v2807_v0  ;;  %1818 = vmatprep.subr.mxu0 %v2807_v0 }
  0x90   :  { %1848 = vmatpush3.msra.mxu1 %v2219_v38  ;;  %1819 = vmatpush3.msra.mxu0 %v2156_v11  ;;  %v2824_v38 = vld [vmem:[#allocation13_spill] sm:$0xff] }
  0x91   :  { %1849 = vmatprep.subr.mxu1 %v2807_v0  ;;  %1820 = vmatprep.subr.mxu0 %v2807_v0 }
  0x92   :  { %1850 = vmatpush3.msra.mxu1 %v2234_v44  ;;  %1821 = vmatpush3.msra.mxu0 %v2158_v12  ;;  %v2825_v44 = vld [vmem:[#allocation14_spill] sm:$0xff] }
  0x93   :  { %1851 = vmatprep.subr.mxu1 %v2807_v0  ;;  %1822 = vmatprep.subr.mxu0 %v2807_v0 }
  0x94   :  { %1852 = vmatpush3.msra.mxu1 %v2823_v37  ;;  %1823 = vmatpush3.msra.mxu0 %v2167_v17 }
  0x95   :  { %1853 = vmatprep.subr.mxu1 %v2807_v0  ;;  %1824 = vmatprep.subr.mxu0 %v2807_v0 }
  0x96   :  { %1854 = vmatpush3.msra.mxu1 %v2824_v38  ;;  %1825 = vmatpush3.msra.mxu0 %v2189_v25 }
  0x97   :  { %1855 = vmatprep.subr.mxu1 %v2807_v0  ;;  %1826 = vmatprep.subr.mxu0 %v2807_v0 }
  0x98   :  { %1856 = vmatpush3.msra.mxu1 %v2825_v44  ;;  %1827 = vmatpush3.msra.mxu0 %v2195_v28 }
  0x99   :  { %1857 = vmatprep.subr.mxu1 %v2807_v0  ;;  %1828 = vmatprep.subr.mxu0 %v2807_v0 }
  0x9a   :  { %1858 = vmatpush3.msra.mxu1 %v2826_v62  ;;  %1829 = vmatpush3.msra.mxu0 %v2214_v35 }
  0x9b   :  { %1859 = vmatprep.subr.mxu1 %v2807_v0  ;;  %1830 = vmatprep.subr.mxu0 %v2807_v0 }
  0x9c   :  { %1860 = vmatpush3.msra.mxu1 %v2827_v1  ;;  %1831 = vmatpush3.msra.mxu0 %v2236_v45 }
  0x9d   :  { %1861 = vmatprep.subr.mxu1 %v2807_v0  ;;  %1832 = vmatprep.subr.mxu0 %v2807_v0 }
  0x9e   :  { %1862 = vmatpush3.msra.mxu1 %v2828_v26  ;;  %1833 = vmatpush3.msra.mxu0 %v2246_v48 }
  0x9f   :  { %1863 = vmatprep.subr.mxu1 %v2807_v0  ;;  %1834 = vmatprep.subr.mxu0 %v2807_v0 }
  0xa0   :  { %1864 = vmatpush3.msra.mxu1 %v2829_v42  ;;  %1877 = vmatprep.mubr.msk.f32.mxu1 %vm2106_vm0, %v2807_v0 }
  0xa1   :  { %1865 = vmatprep.subr.mxu1 %v2807_v0  ;;  %1835 = vmatpush3.msra.mxu0 %v2273_v59 }
  0xa2   :  { %1866 = vmatpush3.msra.mxu1 %v2366_v60  ;;  %1836 = vmatprep.subr.mxu0 %v2807_v0 }
  0xa3   :  { %1867 = vmatprep.subr.mxu1 %v2807_v0  ;;  %1837 = vmatpush3.msra.mxu0 %v2283_v63 }
  0xa4   :  { %1868 = vmatpush3.msra.mxu1 %v2380_v49  ;;  %1838 = vmatprep.subr.mxu0 %v2807_v0 }
  0xa5   :  { %1869 = vmatprep.subr.mxu1 %v2807_v0  ;;  %1839 = vmatpush3.msra.mxu0 %v2301_v13 }
  0xa6   :  { %1870 = vmatpush3.msra.mxu1 %v2391_v56  ;;  %1840 = vmatprep.subr.mxu0 %v2807_v0 }
  0xa7   :  { %1871 = vmatprep.subr.mxu1 %v2807_v0  ;;  %1841 = vmatpush3.msra.mxu0 %v2319_v32 }
  0xa8   :  { %1872 = vmatpush3.msra.mxu1 %v2399_v2  ;;  %1842 = vmatprep.mubr.msk.f32.mxu0 %vm2106_vm0, %v2807_v0 }
  0xa9   :  { %1873 = vmatprep.subr.mxu1 %v2807_v0  ;;  %1880 = vmatprep.subr.mxu0 %v2807_v0 }
  0xaa   :  { %1874 = vmatpush3.msra.mxu1 %v2406_v14 }
  0xab   :  { %1875 = vmatprep.subr.mxu1 %v2807_v0 }
  0xac   :  { %1876 = vmatpush3.msra.mxu1 %v2412_v33 }
  0xad   :  { %1915 = vmatprep.subr.mxu1 %v2807_v0 }
 0x102   :  { %v150_v56 = vpop.f32.mrf.mxu0 }
 0x104   :  { %v1634_v60 = vpop.f32.mrf.mxu0 }
 0x109   :  { %v301_v49 = vpop.f32.mrf.mxu1 }
 0x10a   :  { %v302_v62 = vadd.f32 %v301_v49, %v150_v56  ;;  %v2831_v56 = vmov 0.0  }
 0x10b   :  { %v1669_v9 = vpop.f32.mrf.mxu1 }
 0x122   :  { %v405_v2 = vpop.f32.mrf.mxu0 }
 0x123   :  { %v406_v26 = vadd.f32 %v405_v2, %v302_v62 }
 0x124   :  { %v1704_v51 = vpop.f32.mrf.mxu0 }
 0x12b   :  { %v494_v37 = vpop.f32.mrf.mxu1 }
 0x12c   :  { %v495_v42 = vadd.f32 %v494_v37, %v406_v26 }
 0x12d   :  { %v1739_v38 = vpop.f32.mrf.mxu1 }
 0x144   :  { %v613_v44 = vpop.f32.mrf.mxu0 }
 0x145   :  { %v614_v14 = vadd.f32 %v613_v44, %v495_v42 }
 0x146   :  { %v1774_v1 = vpop.f32.mrf.mxu0 }
 0x14d   :  { %v700_v36 = vpop.f32.mrf.mxu1 }
 0x14e   :  { %v701_v7 = vadd.f32 %v700_v36, %v614_v14 }
 0x14f   :  { %v1809_v52 = vpop.f32.mrf.mxu1 }
 0x150   :  { %v704_v33 = vmul.f32 0.03125, %v701_v7 }
 0x152   :  { %v2628_v0 = vsub.f32 %v2830_v58, %v704_v33 }
 0x154   :  { %v706_v60 = vmul.f32 %v2628_v0, %v2628_v0 }
 0x156   :  { %v2632_v9 = vand.u32 4294901760, %v706_v60 }
 0x158   :  { %v2635_v51 = vsub.f32 %v706_v60, %v2632_v9  ;;  %1878 = vmatmul.mubr.f32.vlgmr.msra.gmra.mxu1 %v2632_v9 }
 0x159   :  { %1916 = vmatpush3.msra.mxu1 %v2148_v4  ;;  %1947 = vmatprep.mubr.msk.f32.mxu1 %vm2106_vm0, %v2831_v56 }
 0x15a   :  { %1917 = vmatprep.subr.mxu1 %v2831_v56  ;;  %v790_v52 = vand.u32 4294901760, %v2635_v51 }
 0x15b   :  { %1918 = vmatpush3.msra.mxu1 %v2150_v5 }
 0x15c   :  { %1919 = vmatprep.subr.mxu1 %v2831_v56  ;;  %v791_v58 = vsub.f32 %v2635_v51, %v790_v52 }
 0x15d   :  { %1920 = vmatpush3.msra.mxu1 %v2152_v6 }
 0x15e   :  { %1921 = vmatprep.subr.mxu1 %v2831_v56  ;;  %v792_v7 = vand.u32 4294901760, %v791_v58 }
 0x15f   :  { %1922 = vmatpush3.msra.mxu1 %v2154_v10 }
 0x160   :  { %1923 = vmatprep.subr.mxu1 %v2831_v56  ;;  %1843 = vmatmul.mubr.f32.vlgmr.msra.gmra.mxu0 %v792_v7 }
 0x161   :  { %1881 = vmatpush3.msra.mxu0 %v2162_v15  ;;  %1924 = vmatpush3.msra.mxu1 %v2156_v11 }
 0x162   :  { %1882 = vmatprep.subr.mxu0 %v2831_v56  ;;  %1925 = vmatprep.subr.mxu1 %v2831_v56 }
 0x163   :  { %1883 = vmatpush3.msra.mxu0 %v2165_v16  ;;  %1926 = vmatpush3.msra.mxu1 %v2158_v12 }
 0x164   :  { %1884 = vmatprep.subr.mxu0 %v2831_v56  ;;  %1927 = vmatprep.subr.mxu1 %v2831_v56 }
 0x165   :  { %1885 = vmatpush3.msra.mxu0 %v2170_v18  ;;  %1928 = vmatpush3.msra.mxu1 %v2167_v17 }
 0x166   :  { %1886 = vmatprep.subr.mxu0 %v2831_v56  ;;  %1929 = vmatprep.subr.mxu1 %v2831_v56 }
 0x167   :  { %1887 = vmatpush3.msra.mxu0 %v2174_v20  ;;  %1930 = vmatpush3.msra.mxu1 %v2189_v25 }
 0x168   :  { %1888 = vmatprep.subr.mxu0 %v2831_v56  ;;  %1931 = vmatprep.subr.mxu1 %v2831_v56 }
 0x169   :  { %1889 = vmatpush3.msra.mxu0 %v2177_v21  ;;  %1932 = vmatpush3.msra.mxu1 %v2195_v28 }
 0x16a   :  { %1890 = vmatprep.subr.mxu0 %v2831_v56  ;;  %1933 = vmatprep.subr.mxu1 %v2831_v56 }
 0x16b   :  { %1891 = vmatpush3.msra.mxu0 %v2201_v30  ;;  %1934 = vmatpush3.msra.mxu1 %v2214_v35 }
 0x16c   :  { %1892 = vmatprep.subr.mxu0 %v2831_v56  ;;  %1935 = vmatprep.subr.mxu1 %v2831_v56 }
 0x16d   :  { %1893 = vmatpush3.msra.mxu0 %v2211_v34  ;;  %1936 = vmatpush3.msra.mxu1 %v2236_v45 }
 0x16e   :  { %1894 = vmatprep.subr.mxu0 %v2831_v56  ;;  %1937 = vmatprep.subr.mxu1 %v2831_v56 }
 0x16f   :  { %1895 = vmatpush3.msra.mxu0 %v2230_v43  ;;  %1938 = vmatpush3.msra.mxu1 %v2246_v48 }
 0x170   :  { %1896 = vmatprep.subr.mxu0 %v2831_v56  ;;  %1939 = vmatprep.subr.mxu1 %v2831_v56 }
 0x171   :  { %1897 = vmatpush3.msra.mxu0 %v2242_v47  ;;  %1940 = vmatpush3.msra.mxu1 %v2273_v59 }
 0x172   :  { %1898 = vmatprep.subr.mxu0 %v2831_v56  ;;  %1941 = vmatprep.subr.mxu1 %v2831_v56 }
 0x173   :  { %1899 = vmatpush3.msra.mxu0 %v2260_v55  ;;  %1942 = vmatpush3.msra.mxu1 %v2283_v63 }
 0x174   :  { %1900 = vmatprep.subr.mxu0 %v2831_v56  ;;  %1943 = vmatprep.subr.mxu1 %v2831_v56 }
 0x175   :  { %1901 = vmatpush3.msra.mxu0 %v2276_v61  ;;  %1944 = vmatpush3.msra.mxu1 %v2301_v13 }
 0x176   :  { %1902 = vmatprep.subr.mxu0 %v2831_v56  ;;  %1945 = vmatprep.subr.mxu1 %v2831_v56 }
 0x177   :  { %1903 = vmatpush3.msra.mxu0 %v2295_v8  ;;  %1946 = vmatpush3.msra.mxu1 %v2319_v32 }
 0x178   :  { %1904 = vmatprep.subr.mxu0 %v2831_v56  ;;  %1948 = vmatmul.mubr.f32.vlgmr.msra.gmra.mxu1 %v790_v52 }
 0x179   :  { %1985 = vmatprep.subr.mxu1 %v2831_v56  ;;  %1905 = vmatpush3.msra.mxu0 %v2315_v31 }
 0x17a   :  { %1986 = vmatpush3.msra.mxu1 %v2148_v4  ;;  %1906 = vmatprep.subr.mxu0 %v2831_v56  ;;  %v2832_v4 = vld [vmem:[#allocation18_spill] sm:$0xff] }
 0x17b   :  { %1987 = vmatprep.subr.mxu1 %v2831_v56  ;;  %1907 = vmatpush3.msra.mxu0 %v2331_v41 }
 0x17c   :  { %1988 = vmatpush3.msra.mxu1 %v2150_v5  ;;  %1908 = vmatprep.subr.mxu0 %v2831_v56  ;;  %v2833_v5 = vld [vmem:[#allocation20_spill] sm:$0xff] }
 0x17d   :  { %1989 = vmatprep.subr.mxu1 %v2831_v56  ;;  %1909 = vmatpush3.msra.mxu0 %v2346_v54 }
 0x17e   :  { %1990 = vmatpush3.msra.mxu1 %v2152_v6  ;;  %1910 = vmatprep.subr.mxu0 %v2831_v56  ;;  %v2834_v6 = vld [vmem:[#allocation21_spill] sm:$0xff] }
 0x17f   :  { %1991 = vmatprep.subr.mxu1 %v2831_v56  ;;  %1911 = vmatpush3.msra.mxu0 %v2360_v50 }
 0x180   :  { %1912 = vmatprep.mubr.msk.f32.mxu0 %vm2106_vm0, %v2831_v56  ;;  %1992 = vmatpush3.msra.mxu1 %v2154_v10  ;;  %v2835_v10 = vld [vmem:[#allocation22_spill] sm:$0xff] }
 0x181   :  { %1913 = vmatmul.mubr.f32.vlgmr.msra.gmra.mxu0 %v2635_v51  ;;  %1950 = vmatprep.subr.mxu0 %v2831_v56 }
 0x182   :  { %1993 = vmatprep.subr.mxu1 %v2831_v56  ;;  %1951 = vmatpush3.msra.mxu0 %v2181_v22 }
 0x183   :  { %1994 = vmatpush3.msra.mxu1 %v2156_v11  ;;  %1952 = vmatprep.subr.mxu0 %v2831_v56 }
 0x184   :  { %1995 = vmatprep.subr.mxu1 %v2831_v56  ;;  %1953 = vmatpush3.msra.mxu0 %v2184_v23 }
 0x185   :  { %1996 = vmatpush3.msra.mxu1 %v2158_v12  ;;  %1954 = vmatprep.subr.mxu0 %v2831_v56 }
 0x186   :  { %1997 = vmatprep.subr.mxu1 %v2831_v56  ;;  %1955 = vmatpush3.msra.mxu0 %v2187_v24 }
 0x187   :  { %1998 = vmatpush3.msra.mxu1 %v2167_v17  ;;  %1956 = vmatprep.subr.mxu0 %v2831_v56 }
 0x188   :  { %1999 = vmatprep.subr.mxu1 %v2831_v56  ;;  %1957 = vmatpush3.msra.mxu0 %v2193_v27 }
 0x189   :  { %2000 = vmatpush3.msra.mxu1 %v2189_v25  ;;  %1958 = vmatprep.subr.mxu0 %v2831_v56 }
 0x18a   :  { %2001 = vmatprep.subr.mxu1 %v2831_v56  ;;  %1959 = vmatpush3.msra.mxu0 %v2198_v29 }
 0x18b   :  { %2002 = vmatpush3.msra.mxu1 %v2195_v28  ;;  %1960 = vmatprep.subr.mxu0 %v2831_v56 }
 0x18c   :  { %2003 = vmatprep.subr.mxu1 %v2831_v56  ;;  %1961 = vmatpush3.msra.mxu0 %v2224_v40 }
 0x18d   :  { %2004 = vmatpush3.msra.mxu1 %v2214_v35  ;;  %1962 = vmatprep.subr.mxu0 %v2831_v56 }
 0x18e   :  { %2005 = vmatprep.subr.mxu1 %v2831_v56  ;;  %1963 = vmatpush3.msra.mxu0 %v2239_v46 }
 0x18f   :  { %2006 = vmatpush3.msra.mxu1 %v2236_v45  ;;  %1964 = vmatprep.subr.mxu0 %v2831_v56 }
 0x190   :  { %2007 = vmatprep.subr.mxu1 %v2831_v56  ;;  %1965 = vmatpush3.msra.mxu0 %v2257_v53  ;;  %v1394_v53 = vld [vmem:[%s2792_s2] ss:$0 sm:$0xff] }
 0x191   :  { %2008 = vmatpush3.msra.mxu1 %v2246_v48  ;;  %1966 = vmatprep.subr.mxu0 %v2831_v56 }
 0x192   :  { %2009 = vmatprep.subr.mxu1 %v2831_v56  ;;  %1967 = vmatpush3.msra.mxu0 %v2267_v57  ;;  %v1395_v57 = vld [vmem:[%s2793_s3] ss:$0 sm:$0xff] }
 0x193   :  { %2010 = vmatpush3.msra.mxu1 %v2273_v59  ;;  %1968 = vmatprep.subr.mxu0 %v2831_v56 }
 0x194   :  { %2011 = vmatprep.subr.mxu1 %v2831_v56  ;;  %1969 = vmatpush3.msra.mxu0 %v2292_v3 }
 0x195   :  { %2012 = vmatpush3.msra.mxu1 %v2283_v63  ;;  %1970 = vmatprep.subr.mxu0 %v2831_v56 }
 0x196   :  { %2013 = vmatprep.subr.mxu1 %v2831_v56  ;;  %1971 = vmatpush3.msra.mxu0 %v2308_v19 }
 0x197   :  { %2014 = vmatpush3.msra.mxu1 %v2301_v13  ;;  %1972 = vmatprep.subr.mxu0 %v2831_v56 }
 0x198   :  { %2015 = vmatprep.subr.mxu1 %v2831_v56  ;;  %1973 = vmatpush3.msra.mxu0 %v2328_v39 }
 0x199   :  { %2016 = vmatpush3.msra.mxu1 %v2319_v32  ;;  %2017 = vmatprep.mubr.msk.f32.mxu1 %vm2106_vm0, %v2831_v56 }
 0x19a   :  { %1974 = vmatprep.subr.mxu0 %v2831_v56  ;;  %2018 = vmatmul.mubr.f32.vlgmr.msra.gmra.mxu1 %v2632_v9 }
 0x19b   :  { %1975 = vmatpush3.msra.mxu0 %v2832_v4  ;;  %1982 = vmatprep.mubr.msk.f32.mxu0 %vm2106_vm0, %v2831_v56 }
 0x19c   :  { %1976 = vmatprep.subr.mxu0 %v2831_v56 }
 0x19d   :  { %1977 = vmatpush3.msra.mxu0 %v2833_v5 }
 0x19e   :  { %1978 = vmatprep.subr.mxu0 %v2831_v56 }
 0x19f   :  { %1979 = vmatpush3.msra.mxu0 %v2834_v6 }
 0x1a0   :  { %1980 = vmatprep.subr.mxu0 %v2831_v56 }
 0x1a1   :  { %1981 = vmatpush3.msra.mxu0 %v2835_v10 }
 0x1a2   :  { %1983 = vmatmul.mubr.f32.vlgmr.msra.gmra.mxu0 %v2632_v9 }
 0x218   :  { %v945_v11 = vpop.f32.mrf.mxu1 }
 0x21a   :  { %v1879_v12 = vpop.f32.mrf.mxu1 }
 0x220   :  { %v794_v15 = vpop.f32.mrf.mxu0 }
 0x221   :  { %v946_v23 = vadd.f32 %v945_v11, %v794_v15 }
 0x222   :  { %v1844_v16 = vpop.f32.mrf.mxu0 }
 0x238   :  { %v1138_v17 = vpop.f32.mrf.mxu1 }
 0x23a   :  { %v1949_v18 = vpop.f32.mrf.mxu1 }
 0x241   :  { %v1049_v20 = vpop.f32.mrf.mxu0 }
 0x242   :  { %v1050_v25 = vadd.f32 %v1049_v20, %v946_v23 }
 0x243   :  { %v1914_v21 = vpop.f32.mrf.mxu0 }
 0x244   :  { %v1139_v27 = vadd.f32 %v1138_v17, %v1050_v25 }
 0x25a   :  { %v1344_v22 = vpop.f32.mrf.mxu1 }
 0x25c   :  { %v2019_v24 = vpop.f32.mrf.mxu1 }
 0x262   :  { %v1257_v28 = vpop.f32.mrf.mxu0 }
 0x263   :  { %v1258_v29 = vadd.f32 %v1257_v28, %v1139_v27 }
 0x264   :  { %v1984_v30 = vpop.f32.mrf.mxu0 }
 0x265   :  { %v1345_v34 = vadd.f32 %v1344_v22, %v1258_v29 }
 0x267   :  { %v1348_v35 = vmul.f32 0.032258064, %v1345_v34 }
 0x269   :  { %2029 = vrsqrt.f32 %v1348_v35  ;;  %vm1351_vm1 = vcmp.eq.f32.partialorder %v1348_v35, inf  ;;  %v1354_v45 = vand.u32 2147483648, %v1348_v35  ;;  %vm1353_vm2 = vcmp.eq.f32.partialorder %v1348_v35, 0.0 }
 0x276   :  { %v2030_v40 = vpop.eup %2029 }
 0x277   :  { %v1350_v43 = vmul.f32 %v2030_v40, %v1348_v35 }
 0x279   :  { %v1352_v46 = vsel %vm1351_vm1, %v1348_v35, %v1350_v43 }
 0x27a   :  { %v1355_v47 = vsel %vm1353_vm2, %v1354_v45, %v1352_v46 }
 0x27b   :  { %v1356_v48 = vadd.f32 1e-06, %v1355_v47 }
 0x27d   :  { %2031 = vrcp.f32 %v1356_v48 }
 0x28a   :  { %v2032_v50 = vpop.eup %2031 }
 0x28b   :  { %v1360_v55 = vmul.f32 %v2032_v50, %v2628_v0 }
 0x28d   :  { %v1367_v59 = vmul.f32 %v1394_v53, %v1360_v55 }
 0x28f   :  { %v1374_v61 = vadd.f32 %v1395_v57, %v1367_v59 }
 0x291   :  { %1375 = vst [vmem:[#allocation7] sm:$0xff] %v1374_v61 }
 0x292   :  { %1380 = vsyncadd [#allocation4], 64  ;;  %s2107_s6 = smov [#allocation7]  }
 0x293   :  { %s1381_s7 = sshll.u32 %s2107_s6, 4  ;;  %s1382_s7 = int_to_ptr.vmem [resolvable:$true] %s1381_s7 }
 0x294   :  { %s2073_s8 = scalar_lea.vmem %s1382_s7, 64  ;;  %s2077_s9 = scalar_lea.vmem %s1382_s7, 128 }
 0x295   :  { %p2074_p10 = scmp.ne.s32.totalorder %s1382_s7, %s2073_s8  ;;  %p2078_p11 = scmp.lt.s32.totalorder %s1382_s7, %s1382_s7 }
 0x296   :  { %p2079_p12 = scmp.lt.s32.totalorder %s2077_s9, %s2073_s8 }
 0x298   :  { %p2080_p13 = por %p2079_p12, %p2078_p11 }
 0x29a   :  { %p2081_p0 = pnand %p2080_p13, %p2074_p10 }
 0x29c   :  { %2084 = shalt.err (!%p2081_p0)
}
 0x29d   :  { %1387 = dma.vmem_to_hbm [thread:$0]  %s1382_s7, 64, %s2794_s4, [#allocation4], %s2100_s19, %s2100_s19, %s2101_s20  }
 0x29e   :  { %2097 = dma.done.wait [#allocation4], 128  }
 0x29f   :  { %2098 = vsyncadd [#allocation4], 4294967168 }
 0x2a0   :  { %1391 = vsyncpa [#allocation3], 1 }
 0x2a1   :  { %1392 = vsyncpa [#allocation6], 1 }
 0x2a2   :  { %1393 = vsyncpa [#allocation4], 1 }

</bundles_post_ra>
